<compile_context>
chip_gen: v7x
topology: tpu7x:2x2x1
jax: 0.10.0
libtpu: 0.0.40
codegen_flags: <defaults>
</compile_context>

<pallas_src>
import functools

import jax
import jax.numpy as jnp
from jax.experimental import pallas as pl
from jax.experimental.pallas import tpu as pltpu

KERNEL_SIZE = 3
PAD = KERNEL_SIZE // 2  # roll + mask reflect trick below is only valid for PAD == 1

# The PyTorch module defines a learnable temperature (init 0.1) that is never
# used in forward(); kept here only for parity.
TEMPERATURE = 0.1

# Paeth/Smith median-of-9 selection network (19 compare-exchanges; min -> first
# index, max -> second).  Element 4 holds the median afterwards.  Unused halves
# of the trailing exchanges are dead-code-eliminated by the compiler.
_MEDIAN9_NET = (
    (1, 2), (4, 5), (7, 8),
    (0, 1), (3, 4), (6, 7),
    (1, 2), (4, 5), (7, 8),
    (0, 3), (5, 8), (4, 7),
    (3, 6), (1, 4), (2, 5),
    (4, 7), (4, 2), (6, 4),
    (4, 2),
)


def _median3x3_kernel(m_ref, x_ref, o_ref, *, w):
    """m_ref: (8, N) int32 boundary masks; x_ref / o_ref: (T, N) flat planes."""
    x = x_ref[...]
    t, n = x.shape

    # Per-lane boundary masks, precomputed once in the wrapper (hoisted off the
    # per-step VPU path).  Broadcast once; reused by every select below.
    c0 = jnp.broadcast_to(m_ref[0:1, :] != 0, (t, n))  # col == 0
    cw = jnp.broadcast_to(m_ref[1:2, :] != 0, (t, n))  # col == W-1
    r0 = jnp.broadcast_to(m_ref[2:3, :] != 0, (t, n))  # row == 0
    rh = jnp.broadcast_to(m_ref[3:4, :] != 0, (t, n))  # row == H-1

    # Static circular lane rotations (XLU): nbr(a, d)[p] == a[(p + d) mod n],
    # per plane (each sublane row rolls independently).  Every wrapped or
    # lane-padded read coincides with a position whose reflect mask selects the
    # other branch, so the wrap is never observed (true only for PAD == 1; see
    # the assert in median_filter).
    def nbr(arr, d):
        return pltpu.roll(arr, (-d) % n, axis=1)

    s_p1, s_m1 = nbr(x, 1), nbr(x, -1)    # col +/- 1
    s_pw, s_mw = nbr(x, w), nbr(x, -w)    # row +/- 1

    # Reflect padding (pad = 1): index -1 -> 1, index K -> K-2.
    L = jnp.where(c0, s_p1, s_m1)
    R = jnp.where(cw, s_m1, s_p1)
    U = jnp.where(r0, s_pw, s_mw)
    D = jnp.where(rh, s_mw, s_pw)

    # Diagonals from the already row-reflected U/D: the row mask is constant
    # within a row, so rolling U/D by one column stays in the correct reflected
    # row; only the column reflect remains (8 selects total instead of 16).
    U_p1, U_m1 = nbr(U, 1), nbr(U, -1)
    D_p1, D_m1 = nbr(D, 1), nbr(D, -1)
    UL = jnp.where(c0, U_p1, U_m1)
    UR = jnp.where(cw, U_m1, U_p1)
    DL = jnp.where(c0, D_p1, D_m1)
    DR = jnp.where(cw, D_m1, D_p1)

    v = [x, L, R, U, D, UL, UR, DL, DR]
    for i, j in _MEDIAN9_NET:
        a, b = v[i], v[j]
        v[i] = jnp.minimum(a, b)
        v[j] = jnp.maximum(a, b)

    o_ref[...] = v[4].astype(o_ref.dtype)


def _choose_tiling(n_planes, n_lanes, itemsize):
    """Pick (planes per grid step, padded plane count).

    T is a multiple of 8 (sublane rule for the (T, N) block), targets ~1 MiB
    input blocks (flat region of the measured tile-size curve), and the plane
    count is padded so there are always >= 2 grid steps (both v7x TensorCores
    get work under dimension_semantics=("parallel",)).  The ~12-15x live
    working set plus double-buffered in/out stays well inside the 32 MiB
    scoped-VMEM budget on every generation (including v7x's 64 MiB VMEM).
    """
    budget = 1 << 20  # bytes per input block
    per_plane = n_lanes * itemsize
    t = max(8, (budget // per_plane) // 8 * 8)
    # Never use a bigger block than needed to produce two grid steps.
    half = -(-n_planes // 2)
    t = min(t, max(8, -(-half // 8) * 8))
    steps = max(2, -(-n_planes // t))
    return t, steps * t


def median_filter(x):
    """x: (B, C, H, W) float32 -> 3x3 median filter with reflect padding."""
    assert KERNEL_SIZE == 3 and PAD == 1, "roll/mask reflect trick assumes pad == 1"
    b, c, h, w = x.shape
    assert h >= 2 and w >= 2, "reflect padding with pad=1 requires H, W >= 2"
    n = h * w
    bc = b * c

    # Lane-dense layout: the H*W pixels of each plane sit on the lane axis,
    # padded to a multiple of 128 so output stores are unmasked full-width vst.
    n_pad = -(-n // 128) * 128
    t, bc_pad = _choose_tiling(bc, n_pad, jnp.dtype(x.dtype).itemsize)
    # TODO(synk): very large planes (8 * H*W * 4B beyond the block budget, e.g.
    # 1024x1024 f32) should switch to H-strip tiling with a 2-row halo instead
    # of whole-plane blocks; the shapes this module targets do not need it.

    xf = x.reshape(bc, n)
    if bc_pad != bc or n_pad != n:
        xf = jnp.pad(xf, ((0, bc_pad - bc), (0, n_pad - n)))

    # Precomputed reflect-boundary masks (hoisted out of the per-step kernel
    # path); padded to 8 sublane rows.  Pad lanes never reach a real output.
    p = jnp.arange(n_pad, dtype=jnp.int32)
    col, row = p % w, p // w
    masks = jnp.stack(
        [(col == 0), (col == w - 1), (row == 0), (row == h - 1)]
    ).astype(jnp.int32)
    masks = jnp.concatenate([masks, jnp.zeros((4, n_pad), jnp.int32)], axis=0)

    grid = (bc_pad // t,)
    kernel = functools.partial(_median3x3_kernel, w=w)

    out_flat = pl.pallas_call(
        kernel,
        out_shape=jax.ShapeDtypeStruct((bc_pad, n_pad), x.dtype),
        grid_spec=pltpu.PrefetchScalarGridSpec(
            num_scalar_prefetch=0,
            grid=grid,
            in_specs=[
                pl.BlockSpec((8, n_pad), lambda i: (0, 0)),   # masks (resident)
                pl.BlockSpec((t, n_pad), lambda i: (i, 0)),   # input planes
            ],
            out_specs=pl.BlockSpec((t, n_pad), lambda i: (i, 0)),
        ),
        compiler_params=pltpu.CompilerParams(
            dimension_semantics=("parallel",),
            vmem_limit_bytes=32 * 1024 * 1024,
        ),
    )(masks, xf)

    return out_flat[:bc, :n].reshape(b, c, h, w)


def _reference_median(x):
    """Pure-JAX reference matching the PyTorch forward exactly."""
    _, _, h, w = x.shape
    xp = jnp.pad(x, ((0, 0), (0, 0), (PAD, PAD), (PAD, PAD)), mode="reflect")
    patches = []
    for dy in range(KERNEL_SIZE):
        for dx in range(KERNEL_SIZE):
            patches.append(xp[:, :, dy:dy + h, dx:dx + w])
    stacked = jnp.stack(patches, axis=2)          # (B, C, k*k, H, W)
    sorted_p = jnp.sort(stacked, axis=2)
    return sorted_p[:, :, KERNEL_SIZE * KERNEL_SIZE // 2, :, :]


if __name__ == "__main__":
    key = jax.random.PRNGKey(0)
    x = jax.random.normal(key, (2, 4, 16, 16), dtype=jnp.float32)

    out = jax.block_until_ready(median_filter(x))

    ref = _reference_median(x)
    assert out.shape == x.shape and out.dtype == x.dtype
    assert jnp.allclose(out, ref, atol=1e-6, rtol=1e-6), "mismatch vs reference"

    print("KERNEL_OK")
</pallas_src>

<mosaic_0001>
module attributes {stable_mosaic.version = 11 : i64} {
  func.func @_median3x3_kernel(%arg0: i32, %arg1: memref<8x256xi32, #tpu.memory_space<vmem>>, %arg2: memref<8x256xf32, #tpu.memory_space<vmem>>, %arg3: memref<8x256xf32, #tpu.memory_space<vmem>>) attributes {dimension_semantics = [#tpu.dimension_semantics<parallel>], iteration_bounds = array<i64: 2>, scalar_prefetch = 0 : i64, scratch_operands = 0 : i64, tpu.core_type = #tpu.core_type<tc>, window_params = [{pipeline_mode = #tpu.pipeline_mode<synchronous>, transform_indices = @transform_0, window_bounds = array<i64: 8, 256>}, {transform_indices = @transform_1, window_bounds = array<i64: 8, 256>}, {transform_indices = @transform_2, window_bounds = array<i64: 8, 256>}]} {
    %c0 = arith.constant 0 : index
    %c0_0 = arith.constant 0 : index
    %0 = vector.load %arg2[%c0, %c0_0] : memref<8x256xf32, #tpu.memory_space<vmem>>, vector<8x256xf32>
    %c0_1 = arith.constant 0 : index
    %c0_2 = arith.constant 0 : index
    %1 = vector.load %arg1[%c0_1, %c0_2] : memref<8x256xi32, #tpu.memory_space<vmem>>, vector<1x256xi32>
    %c0_i32 = arith.constant 0 : i32
    %2 = vector.broadcast %c0_i32 : i32 to vector<1x256xi32>
    %3 = arith.cmpi ne, %1, %2 : vector<1x256xi32>
    %4 = vector.shape_cast %3 : vector<1x256xi1> to vector<1x256xi1>
    %5 = vector.broadcast %4 : vector<1x256xi1> to vector<8x256xi1>
    %c1 = arith.constant 1 : index
    %c0_3 = arith.constant 0 : index
    %6 = vector.load %arg1[%c1, %c0_3] : memref<8x256xi32, #tpu.memory_space<vmem>>, vector<1x256xi32>
    %c0_i32_4 = arith.constant 0 : i32
    %7 = vector.broadcast %c0_i32_4 : i32 to vector<1x256xi32>
    %8 = arith.cmpi ne, %6, %7 : vector<1x256xi32>
    %9 = vector.shape_cast %8 : vector<1x256xi1> to vector<1x256xi1>
    %10 = vector.broadcast %9 : vector<1x256xi1> to vector<8x256xi1>
    %c2 = arith.constant 2 : index
    %c0_5 = arith.constant 0 : index
    %11 = vector.load %arg1[%c2, %c0_5] : memref<8x256xi32, #tpu.memory_space<vmem>>, vector<1x256xi32>
    %c0_i32_6 = arith.constant 0 : i32
    %12 = vector.broadcast %c0_i32_6 : i32 to vector<1x256xi32>
    %13 = arith.cmpi ne, %11, %12 : vector<1x256xi32>
    %14 = vector.shape_cast %13 : vector<1x256xi1> to vector<1x256xi1>
    %15 = vector.broadcast %14 : vector<1x256xi1> to vector<8x256xi1>
    %c3 = arith.constant 3 : index
    %c0_7 = arith.constant 0 : index
    %16 = vector.load %arg1[%c3, %c0_7] : memref<8x256xi32, #tpu.memory_space<vmem>>, vector<1x256xi32>
    %c0_i32_8 = arith.constant 0 : i32
    %17 = vector.broadcast %c0_i32_8 : i32 to vector<1x256xi32>
    %18 = arith.cmpi ne, %16, %17 : vector<1x256xi32>
    %19 = vector.shape_cast %18 : vector<1x256xi1> to vector<1x256xi1>
    %20 = vector.broadcast %19 : vector<1x256xi1> to vector<8x256xi1>
    %c255_i32 = arith.constant 255 : i32
    %21 = tpu.dynamic_rotate %0 by %c255_i32 dim 1 : vector<8x256xf32>, i32 -> vector<8x256xf32>
    %c1_i32 = arith.constant 1 : i32
    %22 = tpu.dynamic_rotate %0 by %c1_i32 dim 1 : vector<8x256xf32>, i32 -> vector<8x256xf32>
    %c240_i32 = arith.constant 240 : i32
    %23 = tpu.dynamic_rotate %0 by %c240_i32 dim 1 : vector<8x256xf32>, i32 -> vector<8x256xf32>
    %c16_i32 = arith.constant 16 : i32
    %24 = tpu.dynamic_rotate %0 by %c16_i32 dim 1 : vector<8x256xf32>, i32 -> vector<8x256xf32>
    %25 = arith.select %5, %21, %22 : vector<8x256xi1>, vector<8x256xf32>
    %26 = arith.select %10, %22, %21 : vector<8x256xi1>, vector<8x256xf32>
    %27 = arith.select %15, %23, %24 : vector<8x256xi1>, vector<8x256xf32>
    %28 = arith.select %20, %24, %23 : vector<8x256xi1>, vector<8x256xf32>
    %c255_i32_9 = arith.constant 255 : i32
    %29 = tpu.dynamic_rotate %27 by %c255_i32_9 dim 1 : vector<8x256xf32>, i32 -> vector<8x256xf32>
    %c1_i32_10 = arith.constant 1 : i32
    %30 = tpu.dynamic_rotate %27 by %c1_i32_10 dim 1 : vector<8x256xf32>, i32 -> vector<8x256xf32>
    %c255_i32_11 = arith.constant 255 : i32
    %31 = tpu.dynamic_rotate %28 by %c255_i32_11 dim 1 : vector<8x256xf32>, i32 -> vector<8x256xf32>
    %c1_i32_12 = arith.constant 1 : i32
    %32 = tpu.dynamic_rotate %28 by %c1_i32_12 dim 1 : vector<8x256xf32>, i32 -> vector<8x256xf32>
    %33 = arith.select %5, %29, %30 : vector<8x256xi1>, vector<8x256xf32>
    %34 = arith.select %10, %30, %29 : vector<8x256xi1>, vector<8x256xf32>
    %35 = arith.select %5, %31, %32 : vector<8x256xi1>, vector<8x256xf32>
    %36 = arith.select %10, %32, %31 : vector<8x256xi1>, vector<8x256xf32>
    %37 = arith.minimumf %25, %26 : vector<8x256xf32>
    %38 = arith.maximumf %25, %26 : vector<8x256xf32>
    %39 = arith.minimumf %28, %33 : vector<8x256xf32>
    %40 = arith.maximumf %28, %33 : vector<8x256xf32>
    %41 = arith.minimumf %35, %36 : vector<8x256xf32>
    %42 = arith.maximumf %35, %36 : vector<8x256xf32>
    %43 = arith.minimumf %0, %37 : vector<8x256xf32>
    %44 = arith.maximumf %0, %37 : vector<8x256xf32>
    %45 = arith.minimumf %27, %39 : vector<8x256xf32>
    %46 = arith.maximumf %27, %39 : vector<8x256xf32>
    %47 = arith.minimumf %34, %41 : vector<8x256xf32>
    %48 = arith.maximumf %34, %41 : vector<8x256xf32>
    %49 = arith.minimumf %44, %38 : vector<8x256xf32>
    %50 = arith.maximumf %44, %38 : vector<8x256xf32>
    %51 = arith.minimumf %46, %40 : vector<8x256xf32>
    %52 = arith.maximumf %46, %40 : vector<8x256xf32>
    %53 = arith.minimumf %48, %42 : vector<8x256xf32>
    %54 = arith.maximumf %48, %42 : vector<8x256xf32>
    %55 = arith.maximumf %43, %45 : vector<8x256xf32>
    %56 = arith.minimumf %52, %54 : vector<8x256xf32>
    %57 = arith.minimumf %51, %53 : vector<8x256xf32>
    %58 = arith.maximumf %51, %53 : vector<8x256xf32>
    %59 = arith.maximumf %55, %47 : vector<8x256xf32>
    %60 = arith.maximumf %49, %57 : vector<8x256xf32>
    %61 = arith.minimumf %50, %56 : vector<8x256xf32>
    %62 = arith.minimumf %60, %58 : vector<8x256xf32>
    %63 = arith.minimumf %62, %61 : vector<8x256xf32>
    %64 = arith.maximumf %62, %61 : vector<8x256xf32>
    %65 = arith.maximumf %59, %63 : vector<8x256xf32>
    %66 = arith.minimumf %65, %64 : vector<8x256xf32>
    %c0_13 = arith.constant 0 : index
    %c0_14 = arith.constant 0 : index
    %67 = vector.load %arg3[%c0_13, %c0_14] : memref<8x256xf32, #tpu.memory_space<vmem>>, vector<8x256xf32>
    tpu.vector_store %arg3[%c0_13, %c0_14], %66 {strides = array<i32>} : memref<8x256xf32, #tpu.memory_space<vmem>>, vector<8x256xf32>,
    return
  }
  func.func @transform_0(%arg0: i32) -> (i32, i32) {
    %c0_i32 = arith.constant 0 : i32
    %c0_i32_0 = arith.constant 0 : i32
    %c0_i32_1 = arith.constant 0 : i32
    return %c0_i32, %c0_i32_0 : i32, i32
  }
  func.func @transform_1(%arg0: i32) -> (i32, i32) {
    %c0_i32 = arith.constant 0 : i32
    %c0_i32_0 = arith.constant 0 : i32
    return %arg0, %c0_i32 : i32, i32
  }
  func.func @transform_2(%arg0: i32) -> (i32, i32) {
    %c0_i32 = arith.constant 0 : i32
    %c0_i32_0 = arith.constant 0 : i32
    return %arg0, %c0_i32 : i32, i32
  }
}

</mosaic_0001>

<bundles_post_ra>
// kernel: tpu_custom_call.1
= control target key start
LH: loop header
LB: loop body
LE: loop exit
PB: predicated region body
PF: predicated region fallthrough
CT: control target
= control target key end

     0   :  { %7 = vsyncpa [#allocation3], 0  ;;  %s1033_s0 = inlined_call_operand.hbm [shape: s32[8,256], index: 0, kind: input, shape index: {}]   ;;  %s1034_s1 = inlined_call_operand.hbm [shape: f32[16,256], index: 1, kind: input, shape index: {}]   ;;  %s1035_s2 = inlined_call_operand.hbm [shape: f32[16,256], index: 2, kind: output, shape index: {}]  }
   0x1   :  { %8 = vsyncpa [#allocation6], 0 }
   0x2   :  { %10 = vsyncpa [#allocation6 + $0x1], 0 }
   0x3   :  { %11 = vsyncpa [#allocation4], 0 }
   0x4   :  { %13 = vsyncpa [#allocation4 + $0x1], 0  ;;  %s692_s9 = smov 0   ;;  %s694_s10 = smov 0  }
   0x5   :  { %s696_s11 = smov 0   ;;  %s698_s12 = smov 0  }
   0x6 LB: > { %s713_s13 = sadd.s32 4294967295, %s667_s12   ;;  %s459_s14 = sadd.s32 4294967294, %s667_s12   ;;  %s667_s12 = sphi %s698_s12, %s1067_s12   ;;  %s663_s11 = sphi %s696_s11, %s1066_s11   ;;  %s659_s10 = sphi %s694_s10, %s1065_s10   ;;  %s655_s9 = sphi %s692_s9, %s1064_s9  }
   0x7   : > { %p60_p0 = scmp.ne.s32.totalorder %s659_s10, %s655_s9  ;;  %p1036_p1 = scmp.eq.s32.totalorder %s713_s13, 0 }
   0x8   : > { %p90_p3 = scmp.eq.s32.totalorder %s459_s14, 1  ;;  %p460_p5 = scmp.ge.s32.totalorder %s667_s12, 1 }
   0x9   : > { %p722_p4 = por %p1036_p1, %p60_p0  ;;  %p97_p7 = scmp.lt.s32.totalorder %s667_s12, 3 }
   0xa   : > { %p727_p6 = por %p90_p3, %p60_p0  ;;  %s669_s18 = smov [#allocation2]  }
   0xb   : > { %s1039_s15 = scalar_select %p722_p4, 1, 0 }
   0xc   : > { %s1040_s16 = scalar_select %p727_p6, 1, 0 }
   0xd   : > { %p732_p8 = pnand %p460_p5, %p97_p7  ;;  %s110_s19 = sshll.u32 %s669_s18, 4  ;;  %s111_s19 = int_to_ptr.vmem [resolvable:$true] %s110_s19 }
   0xe   : > { %s740_s20 = sadd.s32 1, %s667_s12   ;;  %s47_s24 = sadd.s32 1, %s663_s11 }
   0xf   : > { %s1041_s17 = scalar_select %p732_p8, 1, 0 }
  0x10   : > { %p485_p10 = pneg %p732_p8  ;;  %s44_s22 = ssub.s32 %s667_s12, %s740_s20 }
  0x11   : > { %p750_p12 = scmp.eq.s32.totalorder %s44_s22, 0  ;;  %s539_s27 = scalar_lea.hbm %s1033_s0, 256 }
  0x12   : > { %p744_p11 = pnand %p485_p10, %p1036_p1  ;;  %p540_p0 = scmp.ne.s32.totalorder %s1033_s0, %s539_s27 }
  0x13   : > { %s1043_s23 = scalar_select %p750_p12, 1, 0 }
  0x14   : > { %p541_p3 = pneg %p744_p11  ;;  %p546_p10 = scmp.lt.u32.totalorder %s539_s27, %s1033_s0 }
  0x16   : > { %p542_p5 = pnand %p541_p3, %p540_p0 }
  0x18   : > { %p543_p7 = pneg %p542_p5 }
  0x1a   : > { %p548_p9 = pnand %p546_p10, %p543_p7 }
  0x1c   : > { %551 = shalt.err (!%p548_p9)
}
  0x1d   : > { %s552_s4 = scalar_lea.vmem %s111_s19, 256  ;;  %p560_p6 = scmp.lt.s32.totalorder %s111_s19, %s111_s19 }
  0x1e   : > { %p553_p1 = scmp.ne.s32.totalorder %s111_s19, %s552_s4  ;;  %p561_p4 = scmp.lt.s32.totalorder %s552_s4, %s552_s4 }
  0x20   : > { %p555_p2 = pnand %p553_p1, %p541_p3  ;;  %p562_p8 = por %p561_p4, %p560_p6 }
  0x22   : > { %p556_p13 = pneg %p555_p2 }
  0x24   : > { %p563_p12 = pnand %p562_p8, %p556_p13 }
  0x26   : > { %566 = shalt.err (!%p563_p12)
}
  0x27   : > { %488 = dma.hbm_to_vmem [thread:$0]  (!%p744_p11), %s1033_s0, 256, %s111_s19, [#allocation3]  }
  0x28   : > { %p1044_p1 = scmp.ne.s32.totalorder %s1043_s23, 0  ;;  %p55_p2 = scmp.eq.s32.totalorder %s667_s12, 0 }
  0x29   : > { %p1045_p4 = scmp.ne.s32.totalorder %s663_s11, %s659_s10  ;;  %p1046_p6 = scmp.eq.s32.totalorder %s713_s13, 1 }
  0x2a   : > { %s776_s7 = scalar_select %p1044_p1, %s663_s11, %s47_s24  }
  0x2b   : > { %p784_p8 = por %p1046_p6, %p1045_p4  ;;  %p498_p9 = scmp.lt.s32.totalorder %s667_s12, 2 }
  0x2c   : > { %s121_s14 = sand.u32 1, %s663_s11   ;;  %p1048_p12 = pmov %p1045_p4 }
  0x2d   : > { %s463_s18 = sshll.u32 %s121_s14, 4  ;;  %s475_s21 = sshll.u32 %s667_s12, 8 }
  0x2e   : > { %p56_p13 = por %p55_p2, %p1048_p12  ;;  %s797_s19 = scalar_lea.hbm %s1034_s1, %s475_s21 }
  0x2f   : > { %s125_s23 = scalar_lea.vmem [#allocation5], %s463_s18  ;;  %s122_s27 = scalar_lea.sflag [#allocation6], %s121_s14 }
  0x30   : > { %s133_s24 = sshll.u32 %s125_s23, 4  ;;  %p799_p11 = pnand %p498_p9, %p56_p13  ;;  %s803_s24 = int_to_ptr.vmem [resolvable:$true] %s133_s24 }
  0x31   : > { %s567_s28 = scalar_lea.hbm %s797_s19, 256  ;;  %s572_s3 = scalar_lea.hbm %s1034_s1, 512 }
  0x32   : > { %p568_p0 = scmp.ne.s32.totalorder %s797_s19, %s567_s28  ;;  %p569_p3 = pneg %p799_p11 }
  0x33   : > { %p573_p10 = scmp.lt.u32.totalorder %s797_s19, %s1034_s1  ;;  %p574_p1 = scmp.lt.u32.totalorder %s572_s3, %s567_s28 }
  0x34   : > { %p570_p5 = pnand %p569_p3, %p568_p0  ;;  %p576_p4 = scmp.lt.u32.totalorder %s567_s28, %s797_s19 }
  0x35   : > { %p575_p2 = por %p574_p1, %p573_p10 }
  0x36   : > { %p571_p7 = pneg %p570_p5 }
  0x37   : > { %p577_p6 = por %p576_p4, %p575_p2 }
  0x39   : > { %p578_p9 = pnand %p577_p6, %p571_p7 }
  0x3b   : > { %581 = shalt.err (!%p578_p9)
}
  0x3c   : > { %s582_s6 = scalar_lea.vmem %s803_s24, 256  ;;  %s670_s14 = smov [#allocation5]  }
  0x3d   : > { %p583_p12 = scmp.ne.s32.totalorder %s803_s24, %s582_s6  ;;  %s587_s18 = sshll.u32 %s670_s14, 4  ;;  %s588_s18 = int_to_ptr.vmem [resolvable:$false] %s587_s18 }
  0x3e   : > { %s589_s21 = scalar_lea.vmem %s588_s18, 512  ;;  %p590_p5 = scmp.lt.s32.totalorder %s803_s24, %s588_s18 }
  0x3f   : > { %p585_p13 = pnand %p583_p12, %p569_p3  ;;  %p591_p10 = scmp.lt.s32.totalorder %s589_s21, %s582_s6 }
  0x41   : > { %p586_p0 = pneg %p585_p13  ;;  %p592_p1 = por %p591_p10, %p590_p5 }
  0x43   : > { %p593_p2 = pnand %p592_p1, %p586_p0 }
  0x45   : > { %596 = shalt.err (!%p593_p2)
}
  0x46   : > { %492 = dma.hbm_to_vmem [thread:$0]  (!%p799_p11), %s797_s19, 256, %s803_s24, %s122_s27  }
  0x47   : > { %p1050_p7 = scmp.ne.s32.totalorder %s1041_s17, 0 }
  0x48   : > { %p1051_p3 = scmp.eq.s32.totalorder (!%p1050_p7), %s713_s13, 0 }
  0x49   : > { %142 = sbr.rel (%p1050_p7) target bundleno = 370 (0x172), region = 28 }
  0x50   : > { %642 = dma.done.wait (%p1051_p3), [#allocation3], 256   ;;  %p1052_p4 = pmov %p1051_p3 }
  0x51   : > { %s837_s22 = sand.u32 1, %s659_s10   ;;  %p1053_p11 = scmp.ne.s32.totalorder %s1039_s15, 0 }
  0x52   : > { %644 = vsyncadd (%p1052_p4), [#allocation3], 4294967040  ;;  %s468_s25 = sshll.u32 %s837_s22, 4  ;;  %s149_s23 = scalar_lea.sflag [#allocation6], %s837_s22 }
  0x53   : > { %s152_s19 = scalar_lea.vmem [#allocation5], %s468_s25 }
  0x54   : > { %646 = dma.done.wait (%p1053_p11), %s149_s23, 256  }
  0x55   : > { %648 = vsyncadd (%p1053_p11), %s149_s23, 4294967040  ;;  %v847_v0 = vld [vmem:[%s152_s19] sm:$0xff]  ;;  %s671_s17 = smov 16   ;;  %s672_s24 = smov 112   ;;  %v851_v1 = vld [vmem:[%s152_s19 + $0x8] sm:$0xff]  ;;  %v178_v2 = vlaneseq  ;;  %v674_v7 = vmov 0  }
  0x56   : > { %253 = vrot.lane.b32.xlu1 %v847_v0, %s671_s17  ;;  %246 = vrot.lane.b32.xlu0 %v847_v0, %s672_s24  ;;  %s673_s26 = smov 127   ;;  %v203_v3 = vld [vmem:[#allocation2 + $0x2] ss:$8 sm:$0x3]  ;;  %s675_s15 = smov 1  }
  0x57   : > { %v179_v4 = vshrl.u32 %v178_v2, 7  ;;  %vm204_vm0 = vcmp.ne.s32.totalorder %v203_v3, 0  ;;  %v863_v9 = vand.u32 127, %v178_v2  ;;  %v217_v10 = vld [vmem:[#allocation2 + $0x3] ss:$8 sm:$0x3] }
  0x58   : > { %v205_v8 = vsel %vm204_vm0, 1, %v674_v7  ;;  %vm218_vm1 = vcmp.ne.s32.totalorder %v217_v10, 0  ;;  %v175_v28 = vld [vmem:[#allocation2] ss:$8 sm:$0x3]  ;;  %s476_s27 = sshll.u32 %s713_s13, 8 }
  0x59   : > { %v859_v5 = vsub.s32 1, %v179_v4  ;;  %v861_v6 = vsub.s32 0, %v179_v4  ;;  %vm257_vm2 = vcmp.lt.s32.totalorder %v863_v9, 16  ;;  %vm250_vm3 = vcmp.lt.s32.totalorder %v863_v9, 112  ;;  %s172_s28 = scalar_lea.vmem [#allocation7], %s468_s25  ;;  %s989_s4 = scalar_lea.hbm %s1035_s2, %s476_s27 }
  0x5a   : > { %255 = vrot.lane.b32.xlu1 %v851_v1, %s671_s17  ;;  %248 = vrot.lane.b32.xlu0 %v851_v1, %s672_s24  ;;  %v219_v17 = vsel %vm218_vm1, 1, %v674_v7  ;;  %vm176_vm8 = vcmp.ne.s32.totalorder %v175_v28, 0  ;;  %v189_v32 = vld [vmem:[#allocation2 + $0x1] ss:$8 sm:$0x3]  ;;  %vm243_vm10 = vcmp.lt.s32.totalorder %v863_v9, 1 }
  0x5b   : > { %v213_v11 = vrot.slane %v205_v8, %v859_v5  ;;  %v209_v12 = vrot.slane %v205_v8, %v861_v6  ;;  %v227_v24 = vrot.slane %v219_v17, %v859_v5  ;;  %v223_v25 = vrot.slane %v219_v17, %v861_v6  ;;  %s377_s29 = sshll.u32 %s172_s28, 4  ;;  %s363_s13 = scalar_lea.sflag [#allocation4], %s837_s22  ;;  %s991_s29 = int_to_ptr.vmem [resolvable:$true] %s377_s29 }
  0x5c   : > { %v177_v31 = vsel %vm176_vm8, 1, %v674_v7  ;;  %vm190_vm9 = vcmp.ne.s32.totalorder %v189_v32, 0  ;;  %vm236_vm13 = vcmp.lt.s32.totalorder %v863_v9, 127  ;;  %s597_s5 = scalar_lea.vmem %s991_s29, 256  ;;  %s676_s6 = smov [#allocation7]  }
  0x5d   : > { %vm215_vm4 = vcmp.eq.s32.totalorder %v213_v11, 1  ;;  %vm214_vm5 = vcmp.eq.s32.totalorder %v209_v12, 1  ;;  %vm229_vm6 = vcmp.eq.s32.totalorder %v227_v24, 1  ;;  %vm228_vm7 = vcmp.eq.s32.totalorder %v223_v25, 1  ;;  %p598_p6 = scmp.ne.s32.totalorder %s991_s29, %s597_s5  ;;  %s601_s14 = sshll.u32 %s676_s6, 4  ;;  %s602_s14 = int_to_ptr.vmem [resolvable:$false] %s601_s14 }
  0x5e   : > { %232 = vrot.lane.b32.xlu1 %v851_v1, %s673_s26  ;;  %230 = vrot.lane.b32.xlu0 %v847_v0, %s673_s26  ;;  %v181_v35 = vrot.slane %v177_v31, %v861_v6  ;;  %v185_v36 = vrot.slane %v177_v31, %v859_v5  ;;  %v191_v39 = vsel %vm190_vm9, 1, %v674_v7  ;;  %s603_s18 = scalar_lea.vmem %s602_s14, 512  ;;  %p604_p13 = scmp.lt.s32.totalorder %s991_s29, %s602_s14 }
  0x5f   : > { %v195_v46 = vrot.slane %v191_v39, %v861_v6  ;;  %v199_v47 = vrot.slane %v191_v39, %v859_v5  ;;  %p599_p9 = pnand %p598_p6, %p784_p8  ;;  %p605_p0 = scmp.lt.s32.totalorder %s603_s18, %s597_s5 }
  0x60   : > { %vm896_vm11 = vcmp.eq.s32.totalorder %v181_v35, 1  ;;  %vm900_vm12 = vcmp.eq.s32.totalorder %v185_v36, 1 }
  0x61   : > { %vm919_vm14 = vcmp.eq.s32.totalorder %v195_v46, 1  ;;  %vm923_vm15 = vcmp.eq.s32.totalorder %v199_v47, 1  ;;  %p600_p12 = pneg %p599_p9  ;;  %p606_p5 = por %p605_p0, %p604_p13 }
  0x63   : > { %p607_p10 = pnand %p606_p5, %p600_p12 }
  0xc8   : > { %v254_v13 = vpop.permute.xlu1 %253  ;;  %v247_v14 = vpop.permute.xlu0 %246 }
  0xcc   : > { %v256_v15 = vpop.permute.xlu1 %255  ;;  %v249_v16 = vpop.permute.xlu0 %248 }
  0xcd   : > { %v258_v18 = vsel %vm257_vm2, %v254_v13, %v256_v15  ;;  %v259_v19 = vsel %vm257_vm2, %v256_v15, %v254_v13  ;;  %v251_v20 = vsel %vm250_vm3, %v247_v14, %v249_v16  ;;  %v252_v21 = vsel %vm250_vm3, %v249_v16, %v247_v14 }
  0xce   : > { %v869_v22 = vsel %vm215_vm4, %v252_v21, %v258_v18  ;;  %v871_v23 = vsel %vm214_vm5, %v251_v20, %v259_v19  ;;  %v881_v26 = vsel %vm229_vm6, %v258_v18, %v252_v21  ;;  %v883_v27 = vsel %vm228_vm7, %v259_v19, %v251_v20 }
  0xcf   : > { %270 = vrot.lane.b32.xlu1 %v869_v22, %s673_s26  ;;  %268 = vrot.lane.b32.xlu0 %v871_v23, %s673_s26 }
  0xd0   : > { %v233_v29 = vpop.permute.xlu1 %232  ;;  %v231_v30 = vpop.permute.xlu0 %230 }
  0xd1   : > { %v237_v11 = vsel %vm236_vm13, %v231_v30, %v233_v29  ;;  %v238_v12 = vsel %vm236_vm13, %v233_v29, %v231_v30 }
  0xd3   : > { %276 = vrot.lane.b32.xlu1 %v869_v22, %s675_s15  ;;  %274 = vrot.lane.b32.xlu0 %v871_v23, %s675_s15 }
  0xd7   : > { %282 = vrot.lane.b32.xlu1 %v881_v26, %s673_s26  ;;  %280 = vrot.lane.b32.xlu0 %v883_v27, %s673_s26 }
  0xdb   : > { %288 = vrot.lane.b32.xlu1 %v881_v26, %s675_s15  ;;  %286 = vrot.lane.b32.xlu0 %v883_v27, %s675_s15 }
  0xdf   : > { %241 = vrot.lane.b32.xlu1 %v851_v1, %s675_s15  ;;  %239 = vrot.lane.b32.xlu0 %v847_v0, %s675_s15 }
 0x141   : > { %v271_v33 = vpop.permute.xlu1 %270  ;;  %v269_v34 = vpop.permute.xlu0 %268 }
 0x142   : > { %v272_v44 = vsel %vm236_vm13, %v269_v34, %v271_v33  ;;  %v273_v45 = vsel %vm236_vm13, %v271_v33, %v269_v34 }
 0x145   : > { %v277_v37 = vpop.permute.xlu1 %276  ;;  %v275_v38 = vpop.permute.xlu0 %274 }
 0x146   : > { %v278_v42 = vsel %vm243_vm10, %v275_v38, %v277_v37  ;;  %v279_v43 = vsel %vm243_vm10, %v277_v37, %v275_v38 }
 0x147   : > { %v292_v50 = vsel %vm896_vm11, %v272_v44, %v279_v43  ;;  %v293_v51 = vsel %vm900_vm12, %v273_v45, %v278_v42  ;;  %v294_v6 = vsel %vm919_vm14, %v279_v43, %v272_v44  ;;  %v295_v7 = vsel %vm923_vm15, %v278_v42, %v273_v45 }
 0x148   : > { %v928_v54 = vmin.f32 %v883_v27, %v292_v50  ;;  %v931_v55 = vmin.f32 %v881_v26, %v293_v51  ;;  %v306_v19 = vmax.f32 %v883_v27, %v292_v50  ;;  %v307_v20 = vmax.f32 %v881_v26, %v293_v51 }
 0x149   : > { %v283_v48 = vpop.permute.xlu1 %282  ;;  %v281_v49 = vpop.permute.xlu0 %280 }
 0x14a   : > { %v284_v58 = vsel %vm236_vm13, %v281_v49, %v283_v48  ;;  %v285_v59 = vsel %vm236_vm13, %v283_v48, %v281_v49  ;;  %v318_v15 = vmax.f32 %v871_v23, %v928_v54  ;;  %v319_v16 = vmax.f32 %v869_v22, %v931_v55 }
 0x14b   : > { %v316_v9 = vmin.f32 %v871_v23, %v928_v54  ;;  %v317_v26 = vmin.f32 %v869_v22, %v931_v55 }
 0x14c   : > { %v328_v32 = vmin.f32 %v318_v15, %v306_v19  ;;  %v329_v33 = vmin.f32 %v319_v16, %v307_v20  ;;  %v330_v43 = vmax.f32 %v318_v15, %v306_v19  ;;  %v331_v22 = vmax.f32 %v319_v16, %v307_v20 }
 0x14d   : > { %v289_v56 = vpop.permute.xlu1 %288  ;;  %v287_v57 = vpop.permute.xlu0 %286 }
 0x14e   : > { %v290_v60 = vsel %vm243_vm10, %v287_v57, %v289_v56  ;;  %v291_v61 = vsel %vm243_vm10, %v289_v56, %v287_v57 }
 0x14f   : > { %v296_v62 = vsel %vm896_vm11, %v284_v58, %v291_v61  ;;  %v297_v63 = vsel %vm900_vm12, %v285_v59, %v290_v60  ;;  %v298_v2 = vsel %vm919_vm14, %v291_v61, %v284_v58  ;;  %v299_v3 = vsel %vm923_vm15, %v290_v60, %v285_v59 }
 0x150   : > { %v308_v4 = vmin.f32 %v296_v62, %v298_v2  ;;  %v309_v5 = vmin.f32 %v297_v63, %v299_v3  ;;  %v310_v21 = vmax.f32 %v296_v62, %v298_v2  ;;  %v311_v24 = vmax.f32 %v297_v63, %v299_v3 }
 0x151   : > { %v242_v8 = vpop.permute.xlu1 %241  ;;  %v240_v10 = vpop.permute.xlu0 %239 }
 0x152   : > { %v322_v13 = vmax.f32 %v294_v6, %v308_v4  ;;  %v323_v14 = vmax.f32 %v295_v7, %v309_v5  ;;  %v244_v17 = vsel %vm243_vm10, %v240_v10, %v242_v8  ;;  %v245_v18 = vsel %vm243_vm10, %v242_v8, %v240_v10 }
 0x153   : > { %v260_v25 = vsel %vm896_vm11, %v237_v11, %v245_v18  ;;  %v261_v28 = vsel %vm900_vm12, %v238_v12, %v244_v17  ;;  %v262_v29 = vsel %vm919_vm14, %v245_v18, %v237_v11  ;;  %v263_v30 = vsel %vm923_vm15, %v244_v17, %v238_v12 }
 0x154   : > { %v332_v27 = vmin.f32 %v322_v13, %v310_v21  ;;  %v333_v31 = vmin.f32 %v323_v14, %v311_v24  ;;  %v300_v34 = vmin.f32 %v260_v25, %v262_v29  ;;  %v301_v35 = vmin.f32 %v261_v28, %v263_v30 }
 0x155   : > { %v334_v36 = vmax.f32 %v322_v13, %v310_v21  ;;  %v335_v37 = vmax.f32 %v323_v14, %v311_v24  ;;  %v302_v38 = vmax.f32 %v260_v25, %v262_v29  ;;  %v303_v39 = vmax.f32 %v261_v28, %v263_v30 }
 0x156   : > { %v312_v40 = vmin.f32 %v847_v0, %v300_v34  ;;  %v313_v41 = vmin.f32 %v851_v1, %v301_v35  ;;  %v314_v42 = vmax.f32 %v847_v0, %v300_v34  ;;  %v315_v23 = vmax.f32 %v851_v1, %v301_v35 }
 0x157   : > { %v340_v44 = vmin.f32 %v328_v32, %v332_v27  ;;  %v341_v45 = vmin.f32 %v329_v33, %v333_v31  ;;  %v338_v50 = vmin.f32 %v330_v43, %v334_v36  ;;  %v339_v51 = vmin.f32 %v331_v22, %v335_v37 }
 0x158   : > { %v324_v46 = vmin.f32 %v314_v42, %v302_v38  ;;  %v325_v47 = vmin.f32 %v315_v23, %v303_v39  ;;  %v326_v48 = vmax.f32 %v314_v42, %v302_v38  ;;  %v327_v49 = vmax.f32 %v315_v23, %v303_v39 }
 0x159   : > { %v342_v52 = vmax.f32 %v328_v32, %v332_v27  ;;  %v343_v53 = vmax.f32 %v329_v33, %v333_v31  ;;  %v336_v54 = vmax.f32 %v312_v40, %v316_v9  ;;  %v337_v55 = vmax.f32 %v313_v41, %v317_v26 }
 0x15a   : > { %v346_v56 = vmax.f32 %v324_v46, %v340_v44  ;;  %v347_v0 = vmax.f32 %v325_v47, %v341_v45  ;;  %v320_v57 = vmin.f32 %v294_v6, %v308_v4  ;;  %v321_v1 = vmin.f32 %v295_v7, %v309_v5 }
 0x15b   : > { %v348_v58 = vmin.f32 %v326_v48, %v338_v50  ;;  %v349_v59 = vmin.f32 %v327_v49, %v339_v51 }
 0x15c   : > { %v350_v60 = vmin.f32 %v346_v56, %v342_v52  ;;  %v351_v61 = vmin.f32 %v347_v0, %v343_v53  ;;  %v344_v62 = vmax.f32 %v336_v54, %v320_v57  ;;  %v345_v63 = vmax.f32 %v337_v55, %v321_v1 }
 0x15e   : > { %v352_v2 = vmin.f32 %v350_v60, %v348_v58  ;;  %v353_v3 = vmin.f32 %v351_v61, %v349_v59  ;;  %v354_v8 = vmax.f32 %v350_v60, %v348_v58  ;;  %v355_v10 = vmax.f32 %v351_v61, %v349_v59 }
 0x160   : > { %v356_v11 = vmax.f32 %v344_v62, %v352_v2  ;;  %v357_v12 = vmax.f32 %v345_v63, %v353_v3 }
 0x162   : > { %v358_v4 = vmin.f32 %v356_v11, %v354_v8  ;;  %v359_v5 = vmin.f32 %v357_v12, %v355_v10 }
 0x164   : > { %360 = vst [vmem:[%s172_s28] sm:$0xff] %v358_v4  ;;  %361 = vst [vmem:[%s172_s28 + $0x8] sm:$0xff] %v359_v5 }
 0x165   : > { %610 = shalt.err (!%p607_p10)
}
 0x166   : > { %s611_s21 = scalar_lea.hbm %s989_s4, 256  ;;  %s615_s23 = scalar_lea.hbm %s1035_s2, 512 }
 0x167   : > { %p612_p1 = scmp.ne.s32.totalorder %s989_s4, %s611_s21  ;;  %p616_p3 = scmp.lt.u32.totalorder %s989_s4, %s1035_s2 }
 0x168   : > { %p617_p4 = scmp.lt.u32.totalorder %s615_s23, %s611_s21  ;;  %p619_p6 = scmp.lt.u32.totalorder %s611_s21, %s989_s4 }
 0x169   : > { %p613_p2 = pnand %p612_p1, %p784_p8 }
 0x16a   : > { %p618_p11 = por %p617_p4, %p616_p3 }
 0x16b   : > { %p614_p7 = pneg %p613_p2 }
 0x16c   : > { %p620_p9 = por %p619_p6, %p618_p11 }
 0x16e   : > { %p621_p12 = pnand %p620_p9, %p614_p7 }
 0x170   : > { %624 = shalt.err (!%p621_p12)
}
 0x171   : > { %483 = dma.vmem_to_hbm [thread:$0]  (%p784_p8), %s991_s29, 256, %s989_s4, %s363_s13  }
 0x172 PF: > { %s389_s24 = sand.u32 1, %s655_s9   ;;  %p1062_p13 = scmp.ne.s32.totalorder %s1040_s16, 0 }
 0x173   : > { %p1063_p0 = scmp.ge.s32.totalorder %s667_s12, 2  ;;  %s390_s26 = scalar_lea.sflag [#allocation4], %s389_s24 }
 0x175   : > { %p494_p5 = pnand %p1063_p0, %p1062_p13 }
 0x177   : > { %650 = dma.done.wait (!%p494_p5), %s390_s26, 256  }
 0x178   : > { %652 = vsyncadd (!%p494_p5), %s390_s26, 4294967040  ;;  %p16_p10 = scmp.ge.s32.totalorder %s740_s20, 4   ;;  %s1064_s9 = smov %s659_s10 }
 0x179   : > { %s1065_s10 = smov %s663_s11  ;;  %s1066_s11 = smov %s776_s7 }
 0x17a   : > { %s1067_s12 = smov %s740_s20  ;;  %18 = sbr.rel (!%p16_p10) target bundleno = 6 (0x6), region = 81 }
 0x181   :  { %395 = vsyncpa [#allocation3], 1 }
 0x182   :  { %397 = vsyncpa [#allocation3 + $0x1], 1 }
 0x183   :  { %398 = vsyncpa [#allocation6], 1 }
 0x184   :  { %400 = vsyncpa [#allocation6 + $0x1], 1 }
 0x185   :  { %401 = vsyncpa [#allocation4], 1 }
 0x186   :  { %403 = vsyncpa [#allocation4 + $0x1], 1 }

</bundles_post_ra>
